<compile_context>
chip_gen: v5e
topology: v5e:2x2
jax: 0.10.0
libtpu: 0.0.40
codegen_flags: <defaults>
</compile_context>

<pallas_src>
import jax
import jax.numpy as jnp
from jax.experimental import pallas as pl
from jax.experimental.pallas import tpu as pltpu


def _mmsa_kernel(scal_ref, wx_ref, wf_ref, x_ref, flow_ref, out_ref):
    """Fused per-pixel motion-spatial attention.

    scal_ref: SMEM f32 (2,)   -> [w_maxabs, fused_bias]
    wx_ref:   VMEM f32 (C, 1) -> per-x-channel weight column
    wf_ref:   VMEM f32 (F, 1) -> per-flow-channel weight column (mean folded)
    x_ref:    (C, TP)  pixels on lanes
    flow_ref: (F, TP)
    out_ref:  (C, TP)
    """
    x = x_ref[...].astype(jnp.float32)        # (C, TP)
    fl = flow_ref[...].astype(jnp.float32)    # (F, TP)

    # Linear part: full-vreg VPU multiplies + XLU sublane reductions.
    lin = (jnp.sum(x * wx_ref[...], axis=0, keepdims=True)
           + jnp.sum(fl * wf_ref[...], axis=0, keepdims=True))   # (1, TP)
    maxabs = jnp.max(jnp.abs(fl), axis=0, keepdims=True)          # (1, TP)
    logit = lin + scal_ref[0] * maxabs + scal_ref[1]

    attn = jax.nn.sigmoid(logit)                                  # EUP
    out_ref[...] = (x * (attn + 1.0)).astype(out_ref.dtype)       # x*attn + x


def motion_spatial_attention(x, flow, params, *, vmem_budget_bytes=8 << 20):
    """x: (b, C_in, h, w) NCHW;  flow: any shape reshapeable to (-1, 2, b, h, w)."""
    w_st, b_st, w_m, b_m, w_a, b_a = params
    b, c_in, h, w = x.shape
    p_hw = h * w
    f_in = flow.size // (b * p_hw)          # internal flow channel count F
    out_ch = w_st.shape[0]

    # ---- Compose the linear chain (wrapper-side, tiny) -----------------------
    w_a_st = w_a[:, :out_ch]                                  # (1, O)
    w_a_m = w_a[:, out_ch:]                                   # (1, FO)
    w1 = w_a_st @ w_st                                        # (1, C+2)
    w2 = w_a_m @ w_m                                          # (1, F)
    wx = w1[0, :c_in]                                         # (C,)
    w_avg = w1[0, c_in]
    w_max = w1[0, c_in + 1]
    wf = w2[0] + w_avg / f_in                                 # mean folded into sum
    b_fused = (w_a_st @ b_st)[0, 0] + (w_a_m @ b_m)[0, 0] + b_a[0, 0]

    scal = jnp.stack([w_max, b_fused]).astype(jnp.float32)    # (2,)   -> SMEM
    wx_col = wx.astype(jnp.float32).reshape(c_in, 1)          # (C,1)  -> VMEM
    wf_col = wf.astype(jnp.float32).reshape(f_in, 1)          # (F,1)  -> VMEM

    # ---- Layout: free reshapes only, no HBM transposes -----------------------
    # PyTorch's reshape/flatten/permute followed by our channels-first access
    # cancel exactly: the raw flow buffer already is (F, b, h, w) row-major.
    x3 = x.reshape(b, c_in, p_hw)              # (b, C, P)
    flow3 = flow.reshape(f_in, b, p_hw)        # (F, b, P)

    # Fallback only: pad pixel axis to a multiple of 128 (keeps tiles lane-dense).
    pad = (-p_hw) % 128
    if pad:
        x3 = jnp.pad(x3, ((0, 0), (0, 0), (0, pad)))
        flow3 = jnp.pad(flow3, ((0, 0), (0, 0), (0, pad)))
    p_pad = p_hw + pad
    flow2 = flow3.reshape(f_in, b * p_pad)     # (F, b*P) flat, per-batch indexed

    # ---- Tile choice: biggest 128-multiple divisor of p_pad fitting VMEM -----
    bytes_per_px = 2 * (2 * c_in * x.dtype.itemsize + f_in * flow.dtype.itemsize)
    cap = max(1, (vmem_budget_bytes // bytes_per_px) // 128)
    m = p_pad // 128
    d = next(dd for dd in range(min(m, cap), 0, -1) if m % dd == 0)
    tile_p = 128 * d
    n_pt = p_pad // tile_p

    out3 = pl.pallas_call(
        _mmsa_kernel,
        out_shape=jax.ShapeDtypeStruct((b, c_in, p_pad), x.dtype),
        grid_spec=pltpu.PrefetchScalarGridSpec(
            num_scalar_prefetch=0,
            grid=(b, n_pt),
            in_specs=[
                # fused scalar coefficients: whole array in SMEM
                pl.BlockSpec(memory_space=pltpu.MemorySpace.SMEM),
                # tiny per-channel weight columns, resident full-array blocks
                pl.BlockSpec((c_in, 1), lambda bi, pi: (0, 0)),
                pl.BlockSpec((f_in, 1), lambda bi, pi: (0, 0)),
                # x: batch dim squeezed, channels full, lane-dense pixel tile
                pl.BlockSpec((pl.Squeezed(), c_in, tile_p),
                             lambda bi, pi: (bi, 0, pi)),
                # flow: per-batch pixel window inside the flattened (b*P) axis
                pl.BlockSpec((f_in, tile_p),
                             lambda bi, pi: (0, bi * n_pt + pi)),
            ],
            out_specs=pl.BlockSpec((pl.Squeezed(), c_in, tile_p),
                                   lambda bi, pi: (bi, 0, pi)),
        ),
        compiler_params=pltpu.CompilerParams(
            dimension_semantics=("parallel", "parallel")),
    )(scal, wx_col, wf_col, x3, flow2)

    if pad:
        out3 = out3[..., :p_hw]
    return out3.reshape(b, c_in, h, w)


def init_params(key, in_channels, out_channels, flow_in_channels, flow_out_channels):
    """Deterministic synthetic weights matching the Conv2d(k=1) parameter shapes."""
    ks = jax.random.split(key, 6)

    def u(k, shape, fan_in):
        bound = 1.0 / jnp.sqrt(fan_in)
        return jax.random.uniform(k, shape, jnp.float32, -bound, bound)

    w_st = u(ks[0], (out_channels, in_channels + 2), in_channels + 2)
    b_st = u(ks[1], (out_channels, 1), in_channels + 2)
    w_m = u(ks[2], (flow_out_channels, flow_in_channels), flow_in_channels)
    b_m = u(ks[3], (flow_out_channels, 1), flow_in_channels)
    w_a = u(ks[4], (1, out_channels + flow_out_channels), out_channels + flow_out_channels)
    b_a = u(ks[5], (1, 1), out_channels + flow_out_channels)
    return (w_st, b_st, w_m, b_m, w_a, b_a)


def reference_jax(x, flow, params):
    """Pure-JAX mirror of the (intended) PyTorch forward, NCHW throughout."""
    w_st, b_st, w_m, b_m, w_a, b_a = params
    b, c, h, w = x.shape
    flow_i = flow.reshape(-1, 2, b, h, w).reshape(-1, b, h, w)
    flow_i = jnp.transpose(flow_i, (1, 0, 2, 3))
    avg = jnp.mean(flow_i, axis=1, keepdims=True)
    mx = jnp.max(jnp.abs(flow_i), axis=1, keepdims=True)

    def conv1x1(inp, wgt, bias):
        return jnp.einsum('oc,bchw->bohw', wgt, inp) + bias[None, :, 0, None, None]

    fea_st = conv1x1(jnp.concatenate([x, avg, mx], axis=1), w_st, b_st)
    fea_m = conv1x1(flow_i, w_m, b_m)
    attn = jax.nn.sigmoid(conv1x1(jnp.concatenate([fea_st, fea_m], axis=1), w_a, b_a))
    return x * attn + x


if __name__ == "__main__":
    key = jax.random.PRNGKey(0)
    b, c_in, hgt, wid = 2, 4, 16, 16
    out_channels, flow_in_channels, flow_out_channels = 8, 2, 4

    kx, kf, kp = jax.random.split(key, 3)
    x = jax.random.normal(kx, (b, c_in, hgt, wid), jnp.float32)
    # flow feeds the (-1, 2, b, h, w) reshape; (2, b, h, w) -> F = 2 internal channels
    flow = jax.random.normal(kf, (2, b, hgt, wid), jnp.float32)

    params = init_params(kp, c_in, out_channels, flow_in_channels, flow_out_channels)

    out = motion_spatial_attention(x, flow, params)
    out = jax.block_until_ready(out)

    ref = reference_jax(x, flow, params)
    assert out.shape == x.shape
    assert jnp.allclose(out, ref, atol=1e-5, rtol=1e-5), "mismatch vs JAX reference"

    print("KERNEL_OK")
</pallas_src>

<mosaic_0001>
module attributes {stable_mosaic.version = 11 : i64} {
  func.func @_mmsa_kernel(%arg0: i32, %arg1: i32, %arg2: memref<2xf32, #tpu.memory_space<smem>>, %arg3: memref<4x1xf32, #tpu.memory_space<vmem>>, %arg4: memref<2x1xf32, #tpu.memory_space<vmem>>, %arg5: memref<1x4x256xf32, #tpu.memory_space<vmem>>, %arg6: memref<2x256xf32, #tpu.memory_space<vmem>>, %arg7: memref<1x4x256xf32, #tpu.memory_space<vmem>>) attributes {dimension_semantics = [#tpu.dimension_semantics<parallel>, #tpu.dimension_semantics<parallel>], iteration_bounds = array<i64: 2, 1>, scalar_prefetch = 0 : i64, scratch_operands = 0 : i64, tpu.core_type = #tpu.core_type<tc>, window_params = [{transform_indices = @transform_0, window_bounds = array<i64: 2>}, {pipeline_mode = #tpu.pipeline_mode<synchronous>, transform_indices = @transform_1, window_bounds = array<i64: 4, 1>}, {pipeline_mode = #tpu.pipeline_mode<synchronous>, transform_indices = @transform_2, window_bounds = array<i64: 2, 1>}, {transform_indices = @transform_3, window_bounds = array<i64: 1, 4, 256>}, {transform_indices = @transform_4, window_bounds = array<i64: 2, 256>}, {transform_indices = @transform_5, window_bounds = array<i64: 1, 4, 256>}]} {
    %c0 = arith.constant 0 : index
    %c0_0 = arith.constant 0 : index
    %c0_1 = arith.constant 0 : index
    %0 = vector.load %arg5[%c0, %c0_0, %c0_1] : memref<1x4x256xf32, #tpu.memory_space<vmem>>, vector<1x4x256xf32>
    %1 = vector.shape_cast %0 : vector<1x4x256xf32> to vector<4x256xf32>
    %c0_2 = arith.constant 0 : index
    %c0_3 = arith.constant 0 : index
    %2 = vector.load %arg6[%c0_2, %c0_3] : memref<2x256xf32, #tpu.memory_space<vmem>>, vector<2x256xf32>
    %c0_4 = arith.constant 0 : index
    %c0_5 = arith.constant 0 : index
    %3 = vector.load %arg3[%c0_4, %c0_5] : memref<4x1xf32, #tpu.memory_space<vmem>>, vector<4x1xf32>
    %4 = vector.broadcast %3 : vector<4x1xf32> to vector<4x256xf32>
    %5 = arith.mulf %1, %4 : vector<4x256xf32>
    %cst = arith.constant dense<0.000000e+00> : vector<256xf32>
    %6 = vector.multi_reduction <add>, %5, %cst [0] : vector<4x256xf32> to vector<256xf32>
    %7 = vector.shape_cast %6 : vector<256xf32> to vector<1x256xf32>
    %c0_6 = arith.constant 0 : index
    %c0_7 = arith.constant 0 : index
    %8 = vector.load %arg4[%c0_6, %c0_7] : memref<2x1xf32, #tpu.memory_space<vmem>>, vector<2x1xf32>
    %9 = vector.broadcast %8 : vector<2x1xf32> to vector<2x256xf32>
    %10 = arith.mulf %2, %9 : vector<2x256xf32>
    %cst_8 = arith.constant dense<0.000000e+00> : vector<256xf32>
    %11 = vector.multi_reduction <add>, %10, %cst_8 [0] : vector<2x256xf32> to vector<256xf32>
    %12 = vector.shape_cast %11 : vector<256xf32> to vector<1x256xf32>
    %13 = arith.addf %7, %12 : vector<1x256xf32>
    %14 = math.absf %2 : vector<2x256xf32>
    %cst_9 = arith.constant dense<0xFF800000> : vector<256xf32>
    %15 = vector.multi_reduction <maximumf>, %14, %cst_9 [0] : vector<2x256xf32> to vector<256xf32>
    %16 = vector.shape_cast %15 : vector<256xf32> to vector<1x256xf32>
    %c0_10 = arith.constant 0 : index
    %17 = memref.load %arg2[%c0_10] : memref<2xf32, #tpu.memory_space<smem>>
    %18 = vector.broadcast %17 : f32 to vector<1x256xf32>
    %19 = arith.mulf %18, %16 : vector<1x256xf32>
    %20 = arith.addf %13, %19 : vector<1x256xf32>
    %c1 = arith.constant 1 : index
    %21 = memref.load %arg2[%c1] : memref<2xf32, #tpu.memory_space<smem>>
    %22 = vector.broadcast %21 : f32 to vector<1x256xf32>
    %23 = arith.addf %20, %22 : vector<1x256xf32>
    %24 = arith.negf %23 : vector<1x256xf32>
    %25 = math.exp %24 : vector<1x256xf32>
    %cst_11 = arith.constant 1.000000e+00 : f32
    %26 = vector.broadcast %cst_11 : f32 to vector<1x256xf32>
    %27 = arith.addf %26, %25 : vector<1x256xf32>
    %28 = arith.divf %26, %27 : vector<1x256xf32>
    %cst_12 = arith.constant 1.000000e+00 : f32
    %29 = vector.broadcast %cst_12 : f32 to vector<1x256xf32>
    %30 = arith.addf %28, %29 : vector<1x256xf32>
    %31 = vector.broadcast %30 : vector<1x256xf32> to vector<4x256xf32>
    %32 = arith.mulf %1, %31 : vector<4x256xf32>
    %c0_13 = arith.constant 0 : index
    %c0_14 = arith.constant 0 : index
    %c0_15 = arith.constant 0 : index
    %33 = vector.load %arg7[%c0_13, %c0_14, %c0_15] : memref<1x4x256xf32, #tpu.memory_space<vmem>>, vector<1x4x256xf32>
    %34 = vector.shape_cast %33 : vector<1x4x256xf32> to vector<4x256xf32>
    %35 = vector.shape_cast %32 : vector<4x256xf32> to vector<1x4x256xf32>
    tpu.vector_store %arg7[%c0_13, %c0_14, %c0_15], %35 {strides = array<i32>} : memref<1x4x256xf32, #tpu.memory_space<vmem>>, vector<1x4x256xf32>,
    return
  }
  func.func @transform_0(%arg0: i32, %arg1: i32) -> i32 {
    %c0_i32 = arith.constant 0 : i32
    %c0_i32_0 = arith.constant 0 : i32
    return %c0_i32 : i32
  }
  func.func @transform_1(%arg0: i32, %arg1: i32) -> (i32, i32) {
    %c0_i32 = arith.constant 0 : i32
    %c0_i32_0 = arith.constant 0 : i32
    %c0_i32_1 = arith.constant 0 : i32
    return %c0_i32, %c0_i32_0 : i32, i32
  }
  func.func @transform_2(%arg0: i32, %arg1: i32) -> (i32, i32) {
    %c0_i32 = arith.constant 0 : i32
    %c0_i32_0 = arith.constant 0 : i32
    %c0_i32_1 = arith.constant 0 : i32
    return %c0_i32, %c0_i32_0 : i32, i32
  }
  func.func @transform_3(%arg0: i32, %arg1: i32) -> (i32, i32, i32) {
    %c0_i32 = arith.constant 0 : i32
    %c0_i32_0 = arith.constant 0 : i32
    return %arg0, %c0_i32, %arg1 : i32, i32, i32
  }
  func.func @transform_4(%arg0: i32, %arg1: i32) -> (i32, i32) {
    %c1_i32 = arith.constant 1 : i32
    %0 = arith.muli %arg0, %c1_i32 : i32
    %1 = arith.addi %0, %arg1 : i32
    %c0_i32 = arith.constant 0 : i32
    %c0_i32_0 = arith.constant 0 : i32
    return %c0_i32, %1 : i32, i32
  }
  func.func @transform_5(%arg0: i32, %arg1: i32) -> (i32, i32, i32) {
    %c0_i32 = arith.constant 0 : i32
    %c0_i32_0 = arith.constant 0 : i32
    return %arg0, %c0_i32, %arg1 : i32, i32, i32
  }
}

</mosaic_0001>

<bundles_post_ra>
// kernel: tpu_custom_call.1
= control target key start
LH: loop header
LB: loop body
LE: loop exit
PB: predicated region body
PF: predicated region fallthrough
CT: control target
= control target key end

     0   :  { %s1101_s0 = inlined_call_operand.vmem [shape: f32[2], index: 0, kind: input, shape index: {}]   ;;  %s1102_s1 = inlined_call_operand.vmem [shape: f32[4,1], index: 1, kind: input, shape index: {}]   ;;  %s1103_s2 = inlined_call_operand.vmem [shape: f32[2,1], index: 2, kind: input, shape index: {}]   ;;  %s1104_s3 = inlined_call_operand.hbm [shape: f32[2,4,256], index: 3, kind: input, shape index: {}]   ;;  %s1105_s4 = inlined_call_operand.hbm [shape: f32[2,512], index: 4, kind: input, shape index: {}]   ;;  %s1106_s5 = inlined_call_operand.hbm [shape: f32[2,4,256], index: 5, kind: output, shape index: {}]  }
   0x1   :  { %1110 = sst [smem:[#allocation18_spill]] %s1101_s0 }
   0x2   :  { %10 = vsyncpa [#allocation5], 0 }
   0x3   :  { %11 = vsyncpa [#allocation3], 0 }
   0x4   :  { %13 = vsyncpa [#allocation3 + $0x1], 0 }
   0x5   :  { %14 = vsyncpa [#allocation8], 0 }
   0x6   :  { %16 = vsyncpa [#allocation8 + $0x1], 0 }
   0x7   :  { %17 = vsyncpa [#allocation4], 0 }
   0x8   :  { %19 = vsyncpa [#allocation4 + $0x1], 0  ;;  %s925_s18 = smov 0   ;;  %s927_s19 = smov 0  }
   0x9   :  { %s929_s20 = smov 0   ;;  %s931_s21 = smov 0  }
   0xa   :  { %s933_s22 = smov 0   ;;  %s935_s23 = smov 0  }
   0xb LB: > { %1111 = sst [smem:[#allocation14_spill]] %s877_s20  ;;  %s607_s24 = sadd.s32 4294967295, %s889_s23   ;;  %s889_s23 = sphi %s935_s23, %s25_s23   ;;  %s885_s22 = sphi %s933_s22, %s1130_s22   ;;  %s881_s21 = sphi %s931_s21, %s1129_s21   ;;  %s877_s20 = sphi %s929_s20, %s1125_s20   ;;  %s873_s19 = sphi %s927_s19, %s1128_s19   ;;  %s869_s18 = sphi %s925_s18, %s1127_s18  }
   0xc   : > { %s608_s25 = sadd.s32 4294967294, %s889_s23   ;;  %p122_p0 = scmp.ne.s32.totalorder %s873_s19, %s869_s18 }
   0xd   : > { %p959_p1 = scmp.eq.s32.totalorder %s607_s24, 0  ;;  %p963_p2 = scmp.eq.s32.totalorder %s607_s24, 1 }
   0xe   : > { %p182_p3 = scmp.eq.s32.totalorder %s608_s25, 1  ;;  %p609_p5 = scmp.ge.s32.totalorder %s889_s23, 1 }
   0xf   : > { %p969_p4 = por %p959_p1, %p122_p0  ;;  %p189_p7 = scmp.lt.s32.totalorder %s889_s23, 3 }
  0x10   : > { %p974_p6 = por %p182_p3, %p122_p0  ;;  %s1117_s0 = sld [smem:[#allocation18_spill]] }
  0x11   : > { %p982_p8 = pnand %p609_p5, %p189_p7  ;;  %s37_s9 = sadd.s32 1, %s885_s22 }
  0x12   : > { %s1115_s29 = scalar_select %p974_p6, 1, 0 }
  0x13   : > { %p644_p10 = pneg %p982_p8  ;;  %s109_s10 = sadd.s32 1, %s877_s20 }
  0x14   : > { %1116 = sst [smem:[#allocation15_spill]] %s1115_s29  ;;  %p39_p12 = scmp.ge.s32.totalorder %s37_s9, 2 }
  0x15   : > { %p645_p11 = pnand %p644_p10, %p959_p1  ;;  %s891_s11 = smov [#allocation2]  }
  0x16   : > { %s201_s7 = sshll.u32 %s1117_s0, 4  ;;  %s1132_s9 = smov (%p39_p12, %s37_s9), 0  ;;  %s202_s7 = int_to_ptr.vmem [resolvable:$true] %s201_s7 }
  0x17   : > { %647 = dma.vmem_to_smem (!%p645_p11), %s202_s7, 16, %s891_s11, [#allocation5]  }
  0x18   : > { %1119 = sst [smem:[#allocation16_spill]] %s1132_s9  ;;  %p116_p13 = scmp.ne.s32.totalorder %s877_s20, %s873_s19 }
  0x19   : > { %p117_p0 = scmp.eq.s32.totalorder %s889_s23, 0  ;;  %s104_s12 = ssub.s32 %s885_s22, %s1132_s9 }
  0x1a   : > { %p660_p3 = scmp.lt.s32.totalorder %s889_s23, 2  ;;  %p107_p5 = scmp.eq.s32.totalorder %s104_s12, 0 }
  0x1b   : > { %p118_p7 = por %p117_p0, %p116_p13  ;;  %p1003_p9 = por %p963_p2, %p116_p13 }
  0x1c   : > { %s218_s14 = sand.u32 1, %s877_s20   ;;  %s631_s17 = sshll.u32 %s885_s22, 3 }
  0x1d   : > { %s1009_s15 = scalar_select %p107_p5, %s877_s20, %s109_s10  }
  0x1e   : > { %s612_s16 = sshll.u32 %s218_s14, 3  ;;  %s229_s30 = scalar_lea.hbm %s1104_s3, %s631_s17 }
  0x1f   : > { %1121 = sst [smem:[#allocation17_spill]] %s1009_s15  ;;  %s222_s6 = scalar_lea.vmem [#allocation6], %s612_s16 }
  0x20   : > { %s233_s7 = sshll.u32 %s222_s6, 4  ;;  %s231_s11 = sshll.u32 %s229_s30, 4  ;;  %s234_s7 = int_to_ptr.vmem [resolvable:$true] %s233_s7  ;;  %s232_s11 = int_to_ptr.hbm [resolvable:$true] %s231_s11 }
  0x21   : > { %p649_p10 = pnand %p660_p3, %p118_p7  ;;  %s615_s27 = sshll.u32 %s218_s14, 2 }
  0x22   : > { %s219_s12 = scalar_lea.sflag [#allocation3], %s218_s14  ;;  %s632_s0 = sshll.u32 %s885_s22, 2 }
  0x23   : > { %651 = dma.hbm_to_vmem [thread:$0]  (!%p649_p10), %s232_s11, 128, %s234_s7, %s219_s12  }
  0x24   : > { %s244_s9 = scalar_lea.vmem [#allocation7], %s615_s27  ;;  %s250_s29 = scalar_lea.hbm %s1105_s4, %s632_s0 }
  0x25   : > { %s254_s10 = sshll.u32 %s244_s9, 4  ;;  %s252_s24 = sshll.u32 %s250_s29, 4  ;;  %s255_s10 = int_to_ptr.vmem [resolvable:$true] %s254_s10  ;;  %s253_s24 = int_to_ptr.hbm [resolvable:$true] %s252_s24 }
  0x26   : > { %s241_s16 = scalar_lea.sflag [#allocation8], %s218_s14  ;;  %263 = sbr.rel (%p982_p8) target bundleno = 256 (0x100), region = 40 }
  0x27   : > { %654 = dma.hbm_to_vmem [thread:$0]  (!%p649_p10), %s253_s24, 64, %s255_s10, %s241_s16  }
  0x2b   : > { %852 = dma.done.wait (%p959_p1), [#allocation5], 16  }
  0x2c   : > { %854 = vsyncadd (%p959_p1), [#allocation5], 4294967280  ;;  %s1028_s9 = sand.u32 1, %s873_s19  }
  0x2d   : > { %s620_s0 = sshll.u32 %s1028_s9, 3  ;;  %s271_s20 = scalar_lea.sflag [#allocation3], %s1028_s9 }
  0x2e   : > { %s274_s29 = scalar_lea.vmem [#allocation6], %s620_s0 }
  0x2f   : > { %856 = dma.done.wait (%p969_p4), %s271_s20, 128  }
  0x30   : > { %858 = vsyncadd (%p969_p4), %s271_s20, 4294967168  ;;  %s621_s26 = sshll.u32 %s1028_s9, 2  ;;  %s281_s8 = scalar_lea.sflag [#allocation8], %s1028_s9 }
  0x31   : > { %s284_s14 = scalar_lea.vmem [#allocation7], %s621_s26 }
  0x32   : > { %860 = dma.done.wait (%p969_p4), %s281_s8, 64  }
  0x33   : > { %862 = vsyncadd (%p969_p4), %s281_s8, 4294967232 }
  0x34   : > { %290 = sfence }
  0x35   : > { %v324_v0 = vld [vmem:[%s1102_s1] sm:$0xf]  ;;  %v892_v1 = vmov 0   ;;  %v893_v3 = vmov 839922192   ;;  %v1050_v7 = vld [vmem:[%s274_s29] sm:$0xff] }
  0x36   : > { %715 = vset.pattern.permute.xlu0 %v892_v1  ;;  %v356_v2 = vld [vmem:[%s1103_s2] sm:$0x3]  ;;  %v330_v4 = vunpack.c.l.s4 %v893_v3  ;;  %v894_v9 = vmov 269488144   ;;  %v323_v14 = vld [vmem:[%s284_s14] sm:$0xf] }
  0x37   : > { %327 = vperm.xlu0 %715, %v324_v0   ;;  %v362_v10 = vunpack.c.l.s4 %v894_v9  ;;  %vm341_vm0 = vcmask 1043456   ;;  %v390_v21 = vand.u32 2147483647, %v323_v14  ;;  %vm373_vm1 = vcmask 1041408   ;;  %s411_s28 = sld [smem:[#allocation2]]  ;;  %s633_s7 = sshll.u32 %s881_s21, 3 }
  0x38   : > { %v331_v5 = vunpack.c.0.s8 %v330_v4  ;;  %s623_s6 = sld [smem:[#allocation2 + $0x1]]  ;;  %s482_s12 = scalar_lea.hbm %s1106_s5, %s633_s7 }
  0x39   : > { %v363_v12 = vunpack.c.0.s8 %v362_v10  ;;  %s317_s21 = scalar_lea.vmem [#allocation9], %s620_s0  ;;  %s486_s24 = sshll.u32 %s482_s12, 4  ;;  %s487_s24 = int_to_ptr.hbm [resolvable:$true] %s486_s24 }
  0x3a   : > { %s484_s10 = sshll.u32 %s317_s21, 4  ;;  %s469_s16 = scalar_lea.sflag [#allocation4], %s1028_s9  ;;  %s485_s10 = int_to_ptr.vmem [resolvable:$true] %s484_s10 }
  0x3b   : > { %s813_s20 = sshra.s32 %s487_s24, 4  ;;  %s819_s0 = scalar_lea.hbm %s1106_s5, 16  ;;  %s814_s20 = int_to_ptr.hbm [resolvable:$true] %s813_s20 }
  0x3c   : > { %s815_s29 = scalar_lea.hbm %s814_s20, 8  ;;  %p820_p8 = scmp.lt.s32.totalorder %s814_s20, %s1106_s5 }
  0x3d   : > { %v412_v62 = vstv %s411_s28  ;;  %p816_p1 = scmp.ne.s32.totalorder %s814_s20, %s815_s29  ;;  %p821_p11 = scmp.lt.s32.totalorder %s819_s0, %s815_s29 }
  0x3f   : > { %359 = vperm.xlu0 %715, %v356_v2   ;;  %p817_p2 = pnand %p816_p1, %p1003_p9  ;;  %p822_p12 = por %p821_p11, %p820_p8 }
  0x41   : > { %p818_p4 = pneg %p817_p2 }
  0x43   : > { %p823_p13 = pnand %p822_p12, %p818_p4 }
  0xa9   : > { %v328_v6 = vpop.permute.xlu0 %327 }
  0xaa   : > { %v332_v8 = vperm.slane %v328_v6, %v331_v5 }
  0xac   : > { %v334_v11 = vmul.f32 %v332_v8, %v1050_v7  ;;  %v418_v8 = vstv %s623_s6 }
  0xae   : > { %336 = vst [vmem:[#allocation1] ss:$2 sm:$0xff] %v334_v11 }
  0xb1   : > { %v360_v13 = vpop.permute.xlu0 %359 }
  0xb2   : > { %v364_v15 = vperm.slane %v360_v13, %v363_v12 }
  0xb4   : > { %v366_v16 = vmul.f32 %v364_v15, %v323_v14 }
  0xb5   : > { %v337_v17 = vld.sshfl [vmem:[#allocation1] sm:$0xff pattern:$0x75316420]  ;;  %v338_v18 = vld.sshfl [vmem:[#allocation1 + $0x8] sm:$0xff pattern:$0x75316420] }
  0xb6   : > { %368 = vst [vmem:[#allocation1] ss:$4 sm:$0xff] %v366_v16  ;;  %v342_v19 = vsel %vm341_vm0, %v337_v17, 0.0  ;;  %v349_v20 = vsel %vm341_vm0, %v338_v18, 0.0 }
  0xb7   : > { %v343_v22 = vrot.slane %v342_v19, 4  ;;  %v350_v23 = vrot.slane %v349_v20, 4 }
  0xb9   : > { %v344_v30 = vadd.f32 %v343_v22, %v342_v19  ;;  %v351_v31 = vadd.f32 %v350_v23, %v349_v20 }
  0xbb   : > { %v345_v36 = vrot.slane %v344_v30, 2  ;;  %v352_v37 = vrot.slane %v351_v31, 2 }
  0xbd   : > { %v369_v24 = vld.sshfl [vmem:[#allocation1] sm:$0xff pattern:$0x73625140]  ;;  %v370_v25 = vld.sshfl [vmem:[#allocation1 + $0x8] sm:$0xff pattern:$0x73625140]  ;;  %v346_v46 = vadd.f32 %v345_v36, %v344_v30  ;;  %v353_v47 = vadd.f32 %v352_v37, %v351_v31 }
  0xbe   : > { %392 = vst [vmem:[#allocation1] ss:$4 sm:$0xff] %v390_v21  ;;  %v374_v26 = vsel %vm373_vm1, %v369_v24, 0.0  ;;  %v381_v27 = vsel %vm373_vm1, %v370_v25, 0.0 }
  0xbf   : > { %v375_v28 = vrot.slane %v374_v26, 4  ;;  %v382_v29 = vrot.slane %v381_v27, 4  ;;  %v347_v54 = vrot.slane %v346_v46, 1  ;;  %v354_v55 = vrot.slane %v353_v47, 1 }
  0xc1   : > { %v376_v32 = vadd.f32 %v375_v28, %v374_v26  ;;  %v383_v33 = vadd.f32 %v382_v29, %v381_v27  ;;  %v348_v63 = vadd.f32 %v347_v54, %v346_v46  ;;  %v355_v0 = vadd.f32 %v354_v55, %v353_v47 }
  0xc3   : > { %v377_v34 = vrot.slane %v376_v32, 2  ;;  %v384_v35 = vrot.slane %v383_v33, 2 }
  0xc5   : > { %v393_v38 = vld.sshfl [vmem:[#allocation1] sm:$0xff pattern:$0x73625140]  ;;  %v394_v39 = vld.sshfl [vmem:[#allocation1 + $0x8] sm:$0xff pattern:$0x73625140]  ;;  %v378_v42 = vadd.f32 %v377_v34, %v376_v32  ;;  %v385_v43 = vadd.f32 %v384_v35, %v383_v33 }
  0xc6   : > { %v397_v40 = vsel %vm373_vm1, %v393_v38, -inf  ;;  %v404_v41 = vsel %vm373_vm1, %v394_v39, -inf }
  0xc7   : > { %v398_v44 = vrot.slane %v397_v40, 4  ;;  %v405_v45 = vrot.slane %v404_v41, 4  ;;  %v379_v50 = vrot.slane %v378_v42, 1  ;;  %v386_v51 = vrot.slane %v385_v43, 1 }
  0xc9   : > { %v399_v48 = vmax.f32 %v397_v40, %v398_v44  ;;  %v406_v49 = vmax.f32 %v404_v41, %v405_v45  ;;  %v380_v58 = vadd.f32 %v379_v50, %v378_v42  ;;  %v387_v59 = vadd.f32 %v386_v51, %v385_v43 }
  0xcb   : > { %v400_v52 = vrot.slane %v399_v48, 2  ;;  %v407_v53 = vrot.slane %v406_v49, 2  ;;  %v388_v3 = vadd.f32 %v380_v58, %v348_v63  ;;  %v389_v4 = vadd.f32 %v387_v59, %v355_v0 }
  0xcd   : > { %v401_v56 = vmax.f32 %v399_v48, %v400_v52  ;;  %v408_v57 = vmax.f32 %v406_v49, %v407_v53 }
  0xcf   : > { %v402_v60 = vrot.slane %v401_v56, 1  ;;  %v409_v61 = vrot.slane %v408_v57, 1 }
  0xd1   : > { %v403_v1 = vmax.f32 %v401_v56, %v402_v60  ;;  %v410_v2 = vmax.f32 %v408_v57, %v409_v61 }
  0xd3   : > { %v413_v5 = vmul.f32 %v412_v62, %v403_v1  ;;  %v414_v6 = vmul.f32 %v412_v62, %v410_v2 }
  0xd5   : > { %v415_v9 = vadd.f32 %v413_v5, %v388_v3  ;;  %v416_v10 = vadd.f32 %v414_v6, %v389_v4 }
  0xd7   : > { %v419_v11 = vadd.f32 %v418_v8, %v415_v9  ;;  %v420_v12 = vadd.f32 %v418_v8, %v416_v10 }
  0xd9   : > { %v624_v13 = vmul.f32 -1.442695, %v419_v11  ;;  %v625_v14 = vmul.f32 -1.442695, %v420_v12 }
  0xdb   : > { %716 = vpow2.f32 %v624_v13 }
  0xdc   : > { %718 = vpow2.f32 %v625_v14 }
  0xe1   : > { %v717_v15 = vpop.eup %716 }
  0xe2   : > { %v719_v16 = vpop.eup %718  ;;  %v427_v17 = vadd.f32 1.0, %v717_v15 }
  0xe3   : > { %v428_v18 = vadd.f32 1.0, %v719_v16 }
  0xe4   : > { %720 = vrcp.f32 %v427_v17  ;;  %v440_v26 = vand.u32 2147483648, %v427_v17  ;;  %v438_v28 = vand.u32 2147483647, %v427_v17  ;;  %vm434_vm4 = vweird.f32 %v427_v17 }
  0xe5   : > { %722 = vrcp.f32 %v428_v18  ;;  %v455_v27 = vand.u32 2147483648, %v428_v18  ;;  %v453_v30 = vand.u32 2147483647, %v428_v18  ;;  %vm449_vm6 = vweird.f32 %v428_v18 }
  0xe6   : > { %v441_v34 = vor.u32 1.1754944e-38, %v440_v26  ;;  %vm439_vm8 = vcmp.eq.f32.partialorder %v438_v28, 8.507059e+37 }
  0xe7   : > { %v456_v35 = vor.u32 1.1754944e-38, %v455_v27  ;;  %vm454_vm9 = vcmp.eq.f32.partialorder %v453_v30, 8.507059e+37 }
  0xea   : > { %v721_v19 = vpop.eup %720 }
  0xeb   : > { %v723_v20 = vpop.eup %722  ;;  %v430_v21 = vmul.f32 %v721_v19, %v427_v17  ;;  %vm435_vm2 = vweird.f32 %v721_v19 }
  0xec   : > { %v445_v22 = vmul.f32 %v723_v20, %v428_v18  ;;  %vm450_vm3 = vweird.f32 %v723_v20  ;;  %vm436_vm5 = vmor %vm434_vm4, %vm435_vm2 }
  0xed   : > { %v431_v23 = vsub.f32 1.0, %v430_v21  ;;  %vm451_vm7 = vmor %vm449_vm6, %vm450_vm3 }
  0xee   : > { %v446_v24 = vsub.f32 1.0, %v445_v22 }
  0xef   : > { %v432_v25 = vmul.f32 %v721_v19, %v431_v23 }
  0xf0   : > { %v447_v29 = vmul.f32 %v723_v20, %v446_v24 }
  0xf1   : > { %v433_v31 = vadd.f32 %v721_v19, %v432_v25 }
  0xf2   : > { %v448_v32 = vadd.f32 %v723_v20, %v447_v29 }
  0xf3   : > { %v437_v33 = vsel %vm436_vm5, %v721_v19, %v433_v31 }
  0xf4   : > { %v452_v36 = vsel %vm451_vm7, %v723_v20, %v448_v32  ;;  %v442_v37 = vsel %vm439_vm8, %v441_v34, %v437_v33 }
  0xf5   : > { %v457_v38 = vsel %vm454_vm9, %v456_v35, %v452_v36  ;;  %v459_v40 = vadd.f32 1.0, %v442_v37 }
  0xf6   : > { %v460_v39 = vadd.f32 1.0, %v457_v38 }
  0xf8   : > { %v463_v41 = vrot.slane %v460_v39, 4 }
  0xfa   : > { %v464_v42 = vsel %vm341_vm0, %v459_v40, %v463_v41 }
  0xfb   : > { %v466_v43 = vmul.f32 %v464_v42, %v1050_v7 }
  0xfd   : > { %467 = vst [vmem:[%s317_s21] sm:$0xff] %v466_v43 }
  0xfe   : > { %826 = shalt.err (!%p823_p13)
}
  0xff   : > { %642 = dma.vmem_to_hbm [thread:$0]  (%p1003_p9), %s485_s10, 128, %s487_s24, %s469_s16  }
 0x100 PF: > { %s498_s17 = sand.u32 1, %s869_s18   ;;  %p1123_p0 = scmp.ge.s32.totalorder %s889_s23, 2 }
 0x101   : > { %s499_s25 = scalar_lea.sflag [#allocation4], %s498_s17 }
 0x102   : > { %p656_p3 = pnand %p1123_p0, %p974_p6 }
 0x104   : > { %p657_p5 = pneg %p656_p3 }
 0x106   : > { %864 = dma.done.wait (%p657_p5), %s499_s25, 128  }
 0x107   : > { %866 = vsyncadd (%p657_p5), %s499_s25, 4294967168  ;;  %s25_s23 = sadd.s32 1, %s889_s23   ;;  %s1124_s30 = sld [smem:[#allocation14_spill]] }
 0x108   : > { %p22_p7 = scmp.ge.s32.totalorder %s25_s23, 4   ;;  %s1125_s20 = sld [smem:[#allocation17_spill]] }
 0x109   : > { %s1126_s13 = sld [smem:[#allocation16_spill]]  ;;  %s1127_s18 = smov %s873_s19 }
 0x10a   : > { %s1129_s21 = smov %s885_s22 }
 0x10b   :  { %24 = sbr.rel (!%p22_p7) target bundleno = 11 (0xb), region = 103 }
 0x10d   : > { %s1128_s19 = smov %s1124_s30 }
 0x10f   : > { %s1130_s22 = smov %s1126_s13 }
 0x110   :  { %505 = vsyncpa [#allocation3], 1 }
 0x111   :  { %507 = vsyncpa [#allocation3 + $0x1], 1 }
 0x112   :  { %508 = vsyncpa [#allocation8], 1 }
 0x113   :  { %510 = vsyncpa [#allocation8 + $0x1], 1 }
 0x114   :  { %511 = vsyncpa [#allocation4], 1 }
 0x115   :  { %513 = vsyncpa [#allocation4 + $0x1], 1 }
 0x116   :  { %514 = vsyncpa [#allocation5], 1 }
 0x117   :  { %516 = vsyncpa [#allocation5 + $0x1], 1 }

</bundles_post_ra>
